<compile_context>
chip_gen: v5e
topology: v5e:2x2
jax: 0.10.0
libtpu: 0.0.40
codegen_flags: <defaults>
</compile_context>

<pallas_src>
import functools

import jax
import jax.numpy as jnp
from jax.experimental import pallas as pl
from jax.experimental.pallas import tpu as pltpu


# ----------------------------------------------------------------------------
# Recurrence kernel (time-major)
# ----------------------------------------------------------------------------
def reservoir_recurrence_kernel(
    x_ref,       # (TB, Bc, L)      time-major block of x
    win_ref,     # (L, H_pad)       fused encoder+B weight, zero-padded
    bin_ref,     # (1, H_pad)       fused bias, zero-padded
    A_ref,       # (H_pad, H_pad)   reservoir matrix, zero-padded
    hseq_ref,    # out: (TB, Bc, H_pad)  time-major H_seq_pre block
    hlast_ref,   # out: (Bc, H_pad)      state at the last real timestep
    h_state,     # scratch: (Bc, H_pad)  recurrent state across time blocks
    *,
    j_last: int,
):
    t_blk = pl.program_id(1)
    n_t = pl.num_programs(1)

    TB, Bc, L = x_ref.shape
    H = A_ref.shape[0]

    @pl.when(t_blk == 0)
    def _():
        h_state[...] = jnp.zeros_like(h_state)

    # ---- time-parallel part: fused (encoder -> B) projection, one GEMM ------
    x2d = x_ref[...].reshape(TB * Bc, L)            # layout-preserving collapse
    bu = jnp.dot(x2d, win_ref[...],
                 preferred_element_type=jnp.float32) + bin_ref[...]
    bu3 = bu.reshape(TB, Bc, H)                     # (TB, Bc, H_pad)

    # ---- truly serial part: h_t = h_{t-1} @ A + Bu_t (unrolled over TB) -----
    # bu3[j] reads and hseq_ref[j] stores are full dense (Bc, H_pad) tiles.
    A = A_ref[...]
    h = h_state[...]
    h_final = h
    for j in range(TB):                             # static, fully unrolled
        h = jnp.dot(h, A, preferred_element_type=jnp.float32) + bu3[j]
        hseq_ref[j] = h.astype(hseq_ref.dtype)
        if j == j_last:                             # static capture of the
            h_final = h                             # last *real* timestep
    h_state[...] = h

    @pl.when(t_blk == n_t - 1)
    def _():
        hlast_ref[...] = h_final.astype(hlast_ref.dtype)


# ----------------------------------------------------------------------------
# Head kernel: residual proj + LayerNorm (last step only) + 2-layer MLP
# ----------------------------------------------------------------------------
def head_kernel(
    h_ref,       # (B_pad, H_pad)   state at last real timestep
    x_ref,       # (B_pad, L)       x at last real timestep
    wrT_ref,     # (L, H_pad)
    br_ref,      # (1, H_pad)
    gamma_ref,   # (1, H_pad)
    beta_ref,    # (1, H_pad)
    w1T_ref,     # (H_pad, M_pad)
    b1_ref,      # (1, M_pad)
    w2T_ref,     # (M_pad, H_pad)
    b2_ref,      # (1, H_pad)
    out_ref,     # (B_pad, H_pad)
    *,
    hidden_actual: int,
):
    H = h_ref.shape[-1]
    residual = jnp.dot(x_ref[...], wrT_ref[...],
                       preferred_element_type=jnp.float32) + br_ref[...]
    z = h_ref[...] + residual

    inv_h = 1.0 / hidden_actual
    mean = jnp.sum(z, axis=-1, keepdims=True) * inv_h
    zc = z - mean
    if hidden_actual != H:
        # padded lanes of z are exact zeros; mask them out of the variance
        lane = jax.lax.broadcasted_iota(jnp.int32, z.shape, 1)
        zc = jnp.where(lane < hidden_actual, zc, 0.0)
    var = jnp.sum(zc * zc, axis=-1, keepdims=True) * inv_h
    zn = zc * jax.lax.rsqrt(var + 1e-5)
    zn = zn * gamma_ref[...] + beta_ref[...]

    h1 = jnp.dot(zn, w1T_ref[...],
                 preferred_element_type=jnp.float32) + b1_ref[...]
    h1 = jnp.maximum(h1, 0.0)
    o = jnp.dot(h1, w2T_ref[...],
                preferred_element_type=jnp.float32) + b2_ref[...]
    out_ref[...] = o.astype(out_ref.dtype)


# ----------------------------------------------------------------------------
# Wrapper
# ----------------------------------------------------------------------------
def _round_up(n, m):
    return ((n + m - 1) // m) * m


def _pad2(a, rows, cols):
    return jnp.pad(a, ((0, rows - a.shape[0]), (0, cols - a.shape[1])))


def reservoir_block_forward(x, params):
    """x: (batch, seq_len, input_size).  Returns (out, H_seq_pre) like the
    PyTorch module: out (batch, hidden), H_seq_pre (batch, seq, hidden)."""
    batch, seq_len, input_size = x.shape
    hidden = params["A"].shape[0]
    mlp_hidden = params["w1"].shape[0]

    LANE, SUB = 128, 8

    # Time-block size: larger TB amortizes per-grid-step overhead and grows the
    # M dimension of the fused input GEMM; seq_len is padded to a multiple.
    if seq_len >= 32:
        TB = 32
    elif seq_len >= 16:
        TB = 16
    else:
        TB = 8
    seq_pad = _round_up(seq_len, TB)
    n_t = seq_pad // TB
    j_last = (seq_len - 1) - (n_t - 1) * TB          # static in-block index

    # Leading "parallel" batch-split axis: feeds both TensorCores on v7x when
    # the batch is large enough; size-1 (and harmless) otherwise.
    n_bsplit = 2 if batch > 8 else 1
    B_pad = _round_up(batch, SUB * n_bsplit)
    B_chunk = B_pad // n_bsplit

    H_pad = _round_up(hidden, LANE)
    M_pad = _round_up(mlp_hidden, LANE)
    f32 = jnp.float32

    # ---- fused encoder + B (exact: no nonlinearity between the two linears) --
    #   Bu = x @ (w_B @ w_enc).T + b_enc @ w_B.T
    w_in = _pad2((params["w_B"] @ params["w_enc"]).T, input_size, H_pad)
    b_in = _pad2(params["b_enc"] @ params["w_B"].T, 1, H_pad)
    A = _pad2(params["A"], H_pad, H_pad)

    # ---- x: pad batch & seq, go time-major (seq, batch, feat) ----------------
    x_p = jnp.pad(x, ((0, B_pad - batch), (0, seq_pad - seq_len), (0, 0)))
    x_t = jnp.transpose(x_p, (1, 0, 2)).astype(f32)  # (seq_pad, B_pad, L)
    x_last = x_p[:, seq_len - 1, :].astype(f32)      # (B_pad, L)

    def const_spec(a):
        n = a.ndim
        return pl.BlockSpec(a.shape, lambda b, t, _n=n: (0,) * _n)

    # ---- VMEM budget from actual (layout-padded) block shapes ----------------
    Lp = _round_up(input_size, LANE)
    blk_bytes = 4 * (TB * B_chunk * Lp               # x block
                     + _round_up(input_size, SUB) * H_pad + H_pad  # W_in, b_in
                     + H_pad * H_pad                 # A
                     + TB * B_chunk * H_pad          # hseq block
                     + B_chunk * H_pad)              # hlast block
    vmem_limit = 2 * blk_bytes + 4 * B_chunk * H_pad + (8 << 20)
    vmem_limit = max(32 << 20, min(64 << 20, vmem_limit))  # 64 MiB: v7x-safe

    kernel = functools.partial(reservoir_recurrence_kernel, j_last=j_last)

    hseq_t, h_last = pl.pallas_call(
        kernel,
        out_shape=(
            jax.ShapeDtypeStruct((seq_pad, B_pad, H_pad), f32),
            jax.ShapeDtypeStruct((B_pad, H_pad), f32),
        ),
        grid_spec=pltpu.PrefetchScalarGridSpec(
            num_scalar_prefetch=0,
            grid=(n_bsplit, n_t),
            in_specs=[
                pl.BlockSpec((TB, B_chunk, input_size), lambda b, t: (t, b, 0)),
                const_spec(w_in),
                const_spec(b_in),
                const_spec(A),
            ],
            out_specs=(
                pl.BlockSpec((TB, B_chunk, H_pad), lambda b, t: (t, b, 0)),
                pl.BlockSpec((B_chunk, H_pad), lambda b, t: (b, 0)),
            ),
            scratch_shapes=[pltpu.VMEM((B_chunk, H_pad), f32)],
        ),
        compiler_params=pltpu.CompilerParams(
            dimension_semantics=("parallel", "arbitrary"),
            vmem_limit_bytes=vmem_limit,
        ),
    )(x_t, w_in, b_in, A)

    # ---- tiny head kernel (runs once on the (B, H) final state) --------------
    wrT = _pad2(params["w_r"].T, input_size, H_pad)
    br = _pad2(params["b_r"], 1, H_pad)
    gamma = _pad2(params["gamma"], 1, H_pad)
    beta = _pad2(params["beta"], 1, H_pad)
    w1T = _pad2(params["w1"].T, H_pad, M_pad)
    b1 = _pad2(params["b1"], 1, M_pad)
    w2T = _pad2(params["w2"].T, M_pad, H_pad)
    b2 = _pad2(params["b2"], 1, H_pad)

    out_p = pl.pallas_call(
        functools.partial(head_kernel, hidden_actual=hidden),
        out_shape=jax.ShapeDtypeStruct((B_pad, H_pad), f32),
    )(h_last, x_last, wrT, br, gamma, beta, w1T, b1, w2T, b2)

    # Slice padding off; one transpose of H_seq_pre back to (batch, seq, hidden).
    out = out_p[:batch, :hidden]
    H_seq_pre = jnp.transpose(hseq_t, (1, 0, 2))[:batch, :seq_len, :hidden]
    return out, H_seq_pre


# ----------------------------------------------------------------------------
# Pure-JAX reference (mirrors the PyTorch forward, y_KF=None path)
# ----------------------------------------------------------------------------
def reference_forward(x, params):
    w_enc, b_enc = params["w_enc"], params["b_enc"]
    w_B, A = params["w_B"], params["A"]
    w_r, b_r = params["w_r"], params["b_r"]
    gamma, beta = params["gamma"], params["beta"]
    w1, b1, w2, b2 = params["w1"], params["b1"], params["w2"], params["b2"]

    u = x @ w_enc.T + b_enc            # (B,T,E)
    bu = u @ w_B.T                     # (B,T,H)
    T = x.shape[1]
    h = bu[:, 0]
    hs = [h]
    for t in range(1, T):
        h = h @ A + bu[:, t]
        hs.append(h)
    H_pre = jnp.stack(hs, axis=1)      # (B,T,H)

    residual = x @ w_r.T + b_r
    z = H_pre + residual
    mean = jnp.mean(z, axis=-1, keepdims=True)
    var = jnp.mean((z - mean) ** 2, axis=-1, keepdims=True)
    H_seq = (z - mean) / jnp.sqrt(var + 1e-5) * gamma + beta
    h_last = H_seq[:, -1, :]
    out = jnp.maximum(h_last @ w1.T + b1, 0.0) @ w2.T + b2
    return out, H_pre


# ----------------------------------------------------------------------------
# Parameter init (deterministic, synthetic)
# ----------------------------------------------------------------------------
def make_params(key, input_size, encode_dim, hidden_size, mlp_hidden_dim):
    ks = jax.random.split(key, 8)

    def lin(k, out_d, in_d):
        bound = 1.0 / jnp.sqrt(in_d)
        return jax.random.uniform(k, (out_d, in_d), jnp.float32, -bound, bound)

    # TODO(synk): init_reservoir_matrix is not provided in the source; use a
    # deterministic scaled-Gaussian reservoir (spectral radius ~0.9) instead.
    A = 0.9 * jax.random.normal(ks[0], (hidden_size, hidden_size), jnp.float32) / jnp.sqrt(
        hidden_size
    )

    return {
        "w_enc": lin(ks[1], encode_dim, input_size),
        "b_enc": 0.01 * jax.random.normal(ks[2], (1, encode_dim), jnp.float32),
        "w_B": lin(ks[3], hidden_size, encode_dim),
        "A": A,
        "w_r": lin(ks[4], hidden_size, input_size),
        "b_r": 0.01 * jax.random.normal(ks[5], (1, hidden_size), jnp.float32),
        "gamma": jnp.ones((1, hidden_size), jnp.float32),
        "beta": jnp.zeros((1, hidden_size), jnp.float32),
        "w1": lin(ks[6], mlp_hidden_dim, hidden_size),
        "b1": jnp.zeros((1, mlp_hidden_dim), jnp.float32),
        "w2": lin(ks[7], hidden_size, mlp_hidden_dim),
        "b2": jnp.zeros((1, hidden_size), jnp.float32),
    }


# ----------------------------------------------------------------------------
if __name__ == "__main__":
    batch, seq_len = 2, 8
    input_size, encode_dim, hidden_size, mlp_hidden_dim = 4, 8, 32, 16

    key = jax.random.PRNGKey(0)
    kx, kp = jax.random.split(key)
    x = jax.random.normal(kx, (batch, seq_len, input_size), jnp.float32)
    params = make_params(kp, input_size, encode_dim, hidden_size, mlp_hidden_dim)

    out, H_seq_pre = jax.jit(reservoir_block_forward)(x, params)
    out = jax.block_until_ready(out)
    H_seq_pre = jax.block_until_ready(H_seq_pre)

    out_ref, H_ref = reference_forward(x, params)

    assert out.shape == (batch, hidden_size)
    assert H_seq_pre.shape == (batch, seq_len, hidden_size)
    assert jnp.allclose(out, out_ref, rtol=1e-4, atol=1e-4), "out mismatch"
    assert jnp.allclose(H_seq_pre, H_ref, rtol=1e-4, atol=1e-4), "H_seq_pre mismatch"

    print("KERNEL_OK")
</pallas_src>

<mosaic_0001>
module attributes {stable_mosaic.version = 11 : i64} {
  func.func @head_kernel(%arg0: memref<8x128xf32, #tpu.memory_space<vmem>>, %arg1: memref<8x4xf32, #tpu.memory_space<vmem>>, %arg2: memref<4x128xf32, #tpu.memory_space<vmem>>, %arg3: memref<1x128xf32, #tpu.memory_space<vmem>>, %arg4: memref<1x128xf32, #tpu.memory_space<vmem>>, %arg5: memref<1x128xf32, #tpu.memory_space<vmem>>, %arg6: memref<128x128xf32, #tpu.memory_space<vmem>>, %arg7: memref<1x128xf32, #tpu.memory_space<vmem>>, %arg8: memref<128x128xf32, #tpu.memory_space<vmem>>, %arg9: memref<1x128xf32, #tpu.memory_space<vmem>>, %arg10: memref<8x128xf32, #tpu.memory_space<vmem>>) attributes {dimension_semantics = [], scalar_prefetch = 0 : i64, scratch_operands = 0 : i64, tpu.core_type = #tpu.core_type<tc>} {
    %c0 = arith.constant 0 : index
    %c0_0 = arith.constant 0 : index
    %0 = vector.load %arg1[%c0, %c0_0] : memref<8x4xf32, #tpu.memory_space<vmem>>, vector<8x4xf32>
    %c0_1 = arith.constant 0 : index
    %c0_2 = arith.constant 0 : index
    %1 = vector.load %arg2[%c0_1, %c0_2] : memref<4x128xf32, #tpu.memory_space<vmem>>, vector<4x128xf32>
    %cst = arith.constant dense<0.000000e+00> : vector<8x128xf32>
    %2 = tpu.matmul %0, %1, %cst {dimension_numbers = #tpu.dot_dimension_numbers<[1], [0], [0], [1], [0, 0, 1, 1], [], []>} : vector<8x4xf32>, vector<4x128xf32>, vector<8x128xf32> -> vector<8x128xf32>
    %c0_3 = arith.constant 0 : index
    %c0_4 = arith.constant 0 : index
    %3 = vector.load %arg3[%c0_3, %c0_4] : memref<1x128xf32, #tpu.memory_space<vmem>>, vector<1x128xf32>
    %4 = vector.broadcast %3 : vector<1x128xf32> to vector<8x128xf32>
    %5 = arith.addf %2, %4 : vector<8x128xf32>
    %c0_5 = arith.constant 0 : index
    %c0_6 = arith.constant 0 : index
    %6 = vector.load %arg0[%c0_5, %c0_6] : memref<8x128xf32, #tpu.memory_space<vmem>>, vector<8x128xf32>
    %7 = arith.addf %6, %5 : vector<8x128xf32>
    %cst_7 = arith.constant dense<0.000000e+00> : vector<8xf32>
    %8 = vector.multi_reduction <add>, %7, %cst_7 [1] : vector<8x128xf32> to vector<8xf32>
    %9 = vector.shape_cast %8 : vector<8xf32> to vector<8x1xf32>
    %cst_8 = arith.constant 3.125000e-02 : f32
    %10 = vector.broadcast %cst_8 : f32 to vector<8x1xf32>
    %11 = arith.mulf %9, %10 : vector<8x1xf32>
    %12 = vector.broadcast %11 : vector<8x1xf32> to vector<8x128xf32>
    %13 = arith.subf %7, %12 : vector<8x128xf32>
    %14 = tpu.iota {dimensions = array<i32: 1>} : vector<8x128xi32>
    %c32_i32 = arith.constant 32 : i32
    %15 = vector.broadcast %c32_i32 : i32 to vector<8x128xi32>
    %16 = arith.cmpi slt, %14, %15 : vector<8x128xi32>
    %cst_9 = arith.constant 0.000000e+00 : f32
    %17 = vector.broadcast %cst_9 : f32 to vector<8x128xf32>
    %18 = arith.select %16, %13, %17 : vector<8x128xi1>, vector<8x128xf32>
    %19 = arith.mulf %18, %18 : vector<8x128xf32>
    %cst_10 = arith.constant dense<0.000000e+00> : vector<8xf32>
    %20 = vector.multi_reduction <add>, %19, %cst_10 [1] : vector<8x128xf32> to vector<8xf32>
    %21 = vector.shape_cast %20 : vector<8xf32> to vector<8x1xf32>
    %cst_11 = arith.constant 3.125000e-02 : f32
    %22 = vector.broadcast %cst_11 : f32 to vector<8x1xf32>
    %23 = arith.mulf %21, %22 : vector<8x1xf32>
    %cst_12 = arith.constant 9.99999974E-6 : f32
    %24 = vector.broadcast %cst_12 : f32 to vector<8x1xf32>
    %25 = arith.addf %23, %24 : vector<8x1xf32>
    %26 = math.rsqrt %25 : vector<8x1xf32>
    %27 = vector.broadcast %26 : vector<8x1xf32> to vector<8x128xf32>
    %28 = arith.mulf %18, %27 : vector<8x128xf32>
    %c0_13 = arith.constant 0 : index
    %c0_14 = arith.constant 0 : index
    %29 = vector.load %arg4[%c0_13, %c0_14] : memref<1x128xf32, #tpu.memory_space<vmem>>, vector<1x128xf32>
    %30 = vector.broadcast %29 : vector<1x128xf32> to vector<8x128xf32>
    %31 = arith.mulf %28, %30 : vector<8x128xf32>
    %c0_15 = arith.constant 0 : index
    %c0_16 = arith.constant 0 : index
    %32 = vector.load %arg5[%c0_15, %c0_16] : memref<1x128xf32, #tpu.memory_space<vmem>>, vector<1x128xf32>
    %33 = vector.broadcast %32 : vector<1x128xf32> to vector<8x128xf32>
    %34 = arith.addf %31, %33 : vector<8x128xf32>
    %c0_17 = arith.constant 0 : index
    %c0_18 = arith.constant 0 : index
    %35 = vector.load %arg6[%c0_17, %c0_18] : memref<128x128xf32, #tpu.memory_space<vmem>>, vector<128x128xf32>
    %cst_19 = arith.constant dense<0.000000e+00> : vector<8x128xf32>
    %36 = tpu.matmul %34, %35, %cst_19 {dimension_numbers = #tpu.dot_dimension_numbers<[1], [0], [0], [1], [0, 0, 1, 1], [], []>} : vector<8x128xf32>, vector<128x128xf32>, vector<8x128xf32> -> vector<8x128xf32>
    %c0_20 = arith.constant 0 : index
    %c0_21 = arith.constant 0 : index
    %37 = vector.load %arg7[%c0_20, %c0_21] : memref<1x128xf32, #tpu.memory_space<vmem>>, vector<1x128xf32>
    %38 = vector.broadcast %37 : vector<1x128xf32> to vector<8x128xf32>
    %39 = arith.addf %36, %38 : vector<8x128xf32>
    %cst_22 = arith.constant 0.000000e+00 : f32
    %40 = vector.broadcast %cst_22 : f32 to vector<8x128xf32>
    %41 = arith.maximumf %39, %40 : vector<8x128xf32>
    %c0_23 = arith.constant 0 : index
    %c0_24 = arith.constant 0 : index
    %42 = vector.load %arg8[%c0_23, %c0_24] : memref<128x128xf32, #tpu.memory_space<vmem>>, vector<128x128xf32>
    %cst_25 = arith.constant dense<0.000000e+00> : vector<8x128xf32>
    %43 = tpu.matmul %41, %42, %cst_25 {dimension_numbers = #tpu.dot_dimension_numbers<[1], [0], [0], [1], [0, 0, 1, 1], [], []>} : vector<8x128xf32>, vector<128x128xf32>, vector<8x128xf32> -> vector<8x128xf32>
    %c0_26 = arith.constant 0 : index
    %c0_27 = arith.constant 0 : index
    %44 = vector.load %arg9[%c0_26, %c0_27] : memref<1x128xf32, #tpu.memory_space<vmem>>, vector<1x128xf32>
    %45 = vector.broadcast %44 : vector<1x128xf32> to vector<8x128xf32>
    %46 = arith.addf %43, %45 : vector<8x128xf32>
    %c0_28 = arith.constant 0 : index
    %c0_29 = arith.constant 0 : index
    %47 = vector.load %arg10[%c0_28, %c0_29] : memref<8x128xf32, #tpu.memory_space<vmem>>, vector<8x128xf32>
    tpu.vector_store %arg10[%c0_28, %c0_29], %46 {strides = array<i32>} : memref<8x128xf32, #tpu.memory_space<vmem>>, vector<8x128xf32>,
    return
  }
}

module attributes {stable_mosaic.version = 11 : i64} {
  func.func @reservoir_recurrence_kernel(%arg0: i32, %arg1: i32, %arg2: memref<8x8x4xf32, #tpu.memory_space<vmem>>, %arg3: memref<4x128xf32, #tpu.memory_space<vmem>>, %arg4: memref<1x128xf32, #tpu.memory_space<vmem>>, %arg5: memref<128x128xf32, #tpu.memory_space<vmem>>, %arg6: memref<8x8x128xf32, #tpu.memory_space<vmem>>, %arg7: memref<8x128xf32, #tpu.memory_space<vmem>>, %arg8: memref<8x128xf32, #tpu.memory_space<vmem>>) attributes {dimension_semantics = [#tpu.dimension_semantics<parallel>, #tpu.dimension_semantics<arbitrary>], iteration_bounds = array<i64: 1, 1>, scalar_prefetch = 0 : i64, scratch_operands = 1 : i64, tpu.core_type = #tpu.core_type<tc>, window_params = [{transform_indices = @transform_0, window_bounds = array<i64: 8, 8, 4>}, {pipeline_mode = #tpu.pipeline_mode<synchronous>, transform_indices = @transform_1, window_bounds = array<i64: 4, 128>}, {pipeline_mode = #tpu.pipeline_mode<synchronous>, transform_indices = @transform_2, window_bounds = array<i64: 1, 128>}, {pipeline_mode = #tpu.pipeline_mode<synchronous>, transform_indices = @transform_3, window_bounds = array<i64: 128, 128>}, {transform_indices = @transform_4, window_bounds = array<i64: 8, 8, 128>}, {transform_indices = @transform_5, window_bounds = array<i64: 8, 128>}]} {
    %c0_i32 = arith.constant 0 : i32
    %0 = arith.cmpi eq, %arg1, %c0_i32 : i32
    %1 = arith.extui %0 : i1 to i32
    %c0_i32_0 = arith.constant 0 : i32
    %2 = arith.cmpi ne, %1, %c0_i32_0 : i32
    scf.if %2 {
      %cst_40 = arith.constant 0.000000e+00 : f32
      %73 = vector.broadcast %cst_40 : f32 to vector<8x128xf32>
      %c0_41 = arith.constant 0 : index
      %c0_42 = arith.constant 0 : index
      %74 = vector.load %arg8[%c0_41, %c0_42] : memref<8x128xf32, #tpu.memory_space<vmem>>, vector<8x128xf32>
      tpu.vector_store %arg8[%c0_41, %c0_42], %73 {strides = array<i32>} : memref<8x128xf32, #tpu.memory_space<vmem>>, vector<8x128xf32>,
    } else {
    }
    %c0 = arith.constant 0 : index
    %c0_1 = arith.constant 0 : index
    %c0_2 = arith.constant 0 : index
    %3 = vector.load %arg2[%c0, %c0_1, %c0_2] : memref<8x8x4xf32, #tpu.memory_space<vmem>>, vector<8x8x4xf32>
    %4 = vector.shape_cast %3 : vector<8x8x4xf32> to vector<64x4xf32>
    %c0_3 = arith.constant 0 : index
    %c0_4 = arith.constant 0 : index
    %5 = vector.load %arg3[%c0_3, %c0_4] : memref<4x128xf32, #tpu.memory_space<vmem>>, vector<4x128xf32>
    %cst = arith.constant dense<0.000000e+00> : vector<64x128xf32>
    %6 = tpu.matmul %4, %5, %cst {dimension_numbers = #tpu.dot_dimension_numbers<[1], [0], [0], [1], [0, 0, 1, 1], [], []>} : vector<64x4xf32>, vector<4x128xf32>, vector<64x128xf32> -> vector<64x128xf32>
    %c0_5 = arith.constant 0 : index
    %c0_6 = arith.constant 0 : index
    %7 = vector.load %arg4[%c0_5, %c0_6] : memref<1x128xf32, #tpu.memory_space<vmem>>, vector<1x128xf32>
    %8 = vector.broadcast %7 : vector<1x128xf32> to vector<64x128xf32>
    %9 = arith.addf %6, %8 : vector<64x128xf32>
    %10 = vector.shape_cast %9 : vector<64x128xf32> to vector<8x8x128xf32>
    %c0_7 = arith.constant 0 : index
    %c0_8 = arith.constant 0 : index
    %11 = vector.load %arg5[%c0_7, %c0_8] : memref<128x128xf32, #tpu.memory_space<vmem>>, vector<128x128xf32>
    %c0_9 = arith.constant 0 : index
    %c0_10 = arith.constant 0 : index
    %12 = vector.load %arg8[%c0_9, %c0_10] : memref<8x128xf32, #tpu.memory_space<vmem>>, vector<8x128xf32>
    %cst_11 = arith.constant dense<0.000000e+00> : vector<8x128xf32>
    %13 = tpu.matmul %12, %11, %cst_11 {dimension_numbers = #tpu.dot_dimension_numbers<[1], [0], [0], [1], [0, 0, 1, 1], [], []>} : vector<8x128xf32>, vector<128x128xf32>, vector<8x128xf32> -> vector<8x128xf32>
    %14 = vector.extract_strided_slice %10 {offsets = [0, 0, 0], sizes = [1, 8, 128], strides = [1, 1, 1]} : vector<8x8x128xf32> to vector<1x8x128xf32>
    %15 = vector.shape_cast %14 : vector<1x8x128xf32> to vector<8x128xf32>
    %16 = arith.addf %13, %15 : vector<8x128xf32>
    %c0_12 = arith.constant 0 : index
    %c0_13 = arith.constant 0 : index
    %c0_14 = arith.constant 0 : index
    %17 = vector.load %arg6[%c0_12, %c0_13, %c0_14] : memref<8x8x128xf32, #tpu.memory_space<vmem>>, vector<1x8x128xf32>
    %18 = vector.shape_cast %17 : vector<1x8x128xf32> to vector<8x128xf32>
    %19 = vector.shape_cast %16 : vector<8x128xf32> to vector<1x8x128xf32>
    tpu.vector_store %arg6[%c0_12, %c0_13, %c0_14], %19 {strides = array<i32>} : memref<8x8x128xf32, #tpu.memory_space<vmem>>, vector<1x8x128xf32>,
    %cst_15 = arith.constant dense<0.000000e+00> : vector<8x128xf32>
    %20 = tpu.matmul %16, %11, %cst_15 {dimension_numbers = #tpu.dot_dimension_numbers<[1], [0], [0], [1], [0, 0, 1, 1], [], []>} : vector<8x128xf32>, vector<128x128xf32>, vector<8x128xf32> -> vector<8x128xf32>
    %21 = vector.extract_strided_slice %10 {offsets = [1, 0, 0], sizes = [1, 8, 128], strides = [1, 1, 1]} : vector<8x8x128xf32> to vector<1x8x128xf32>
    %22 = vector.shape_cast %21 : vector<1x8x128xf32> to vector<8x128xf32>
    %23 = arith.addf %20, %22 : vector<8x128xf32>
    %c1 = arith.constant 1 : index
    %c0_16 = arith.constant 0 : index
    %c0_17 = arith.constant 0 : index
    %24 = vector.load %arg6[%c1, %c0_16, %c0_17] : memref<8x8x128xf32, #tpu.memory_space<vmem>>, vector<1x8x128xf32>
    %25 = vector.shape_cast %24 : vector<1x8x128xf32> to vector<8x128xf32>
    %26 = vector.shape_cast %23 : vector<8x128xf32> to vector<1x8x128xf32>
    tpu.vector_store %arg6[%c1, %c0_16, %c0_17], %26 {strides = array<i32>} : memref<8x8x128xf32, #tpu.memory_space<vmem>>, vector<1x8x128xf32>,
    %cst_18 = arith.constant dense<0.000000e+00> : vector<8x128xf32>
    %27 = tpu.matmul %23, %11, %cst_18 {dimension_numbers = #tpu.dot_dimension_numbers<[1], [0], [0], [1], [0, 0, 1, 1], [], []>} : vector<8x128xf32>, vector<128x128xf32>, vector<8x128xf32> -> vector<8x128xf32>
    %28 = vector.extract_strided_slice %10 {offsets = [2, 0, 0], sizes = [1, 8, 128], strides = [1, 1, 1]} : vector<8x8x128xf32> to vector<1x8x128xf32>
    %29 = vector.shape_cast %28 : vector<1x8x128xf32> to vector<8x128xf32>
    %30 = arith.addf %27, %29 : vector<8x128xf32>
    %c2 = arith.constant 2 : index
    %c0_19 = arith.constant 0 : index
    %c0_20 = arith.constant 0 : index
    %31 = vector.load %arg6[%c2, %c0_19, %c0_20] : memref<8x8x128xf32, #tpu.memory_space<vmem>>, vector<1x8x128xf32>
    %32 = vector.shape_cast %31 : vector<1x8x128xf32> to vector<8x128xf32>
    %33 = vector.shape_cast %30 : vector<8x128xf32> to vector<1x8x128xf32>
    tpu.vector_store %arg6[%c2, %c0_19, %c0_20], %33 {strides = array<i32>} : memref<8x8x128xf32, #tpu.memory_space<vmem>>, vector<1x8x128xf32>,
    %cst_21 = arith.constant dense<0.000000e+00> : vector<8x128xf32>
    %34 = tpu.matmul %30, %11, %cst_21 {dimension_numbers = #tpu.dot_dimension_numbers<[1], [0], [0], [1], [0, 0, 1, 1], [], []>} : vector<8x128xf32>, vector<128x128xf32>, vector<8x128xf32> -> vector<8x128xf32>
    %35 = vector.extract_strided_slice %10 {offsets = [3, 0, 0], sizes = [1, 8, 128], strides = [1, 1, 1]} : vector<8x8x128xf32> to vector<1x8x128xf32>
    %36 = vector.shape_cast %35 : vector<1x8x128xf32> to vector<8x128xf32>
    %37 = arith.addf %34, %36 : vector<8x128xf32>
    %c3 = arith.constant 3 : index
    %c0_22 = arith.constant 0 : index
    %c0_23 = arith.constant 0 : index
    %38 = vector.load %arg6[%c3, %c0_22, %c0_23] : memref<8x8x128xf32, #tpu.memory_space<vmem>>, vector<1x8x128xf32>
    %39 = vector.shape_cast %38 : vector<1x8x128xf32> to vector<8x128xf32>
    %40 = vector.shape_cast %37 : vector<8x128xf32> to vector<1x8x128xf32>
    tpu.vector_store %arg6[%c3, %c0_22, %c0_23], %40 {strides = array<i32>} : memref<8x8x128xf32, #tpu.memory_space<vmem>>, vector<1x8x128xf32>,
    %cst_24 = arith.constant dense<0.000000e+00> : vector<8x128xf32>
    %41 = tpu.matmul %37, %11, %cst_24 {dimension_numbers = #tpu.dot_dimension_numbers<[1], [0], [0], [1], [0, 0, 1, 1], [], []>} : vector<8x128xf32>, vector<128x128xf32>, vector<8x128xf32> -> vector<8x128xf32>
    %42 = vector.extract_strided_slice %10 {offsets = [4, 0, 0], sizes = [1, 8, 128], strides = [1, 1, 1]} : vector<8x8x128xf32> to vector<1x8x128xf32>
    %43 = vector.shape_cast %42 : vector<1x8x128xf32> to vector<8x128xf32>
    %44 = arith.addf %41, %43 : vector<8x128xf32>
    %c4 = arith.constant 4 : index
    %c0_25 = arith.constant 0 : index
    %c0_26 = arith.constant 0 : index
    %45 = vector.load %arg6[%c4, %c0_25, %c0_26] : memref<8x8x128xf32, #tpu.memory_space<vmem>>, vector<1x8x128xf32>
    %46 = vector.shape_cast %45 : vector<1x8x128xf32> to vector<8x128xf32>
    %47 = vector.shape_cast %44 : vector<8x128xf32> to vector<1x8x128xf32>
    tpu.vector_store %arg6[%c4, %c0_25, %c0_26], %47 {strides = array<i32>} : memref<8x8x128xf32, #tpu.memory_space<vmem>>, vector<1x8x128xf32>,
    %cst_27 = arith.constant dense<0.000000e+00> : vector<8x128xf32>
    %48 = tpu.matmul %44, %11, %cst_27 {dimension_numbers = #tpu.dot_dimension_numbers<[1], [0], [0], [1], [0, 0, 1, 1], [], []>} : vector<8x128xf32>, vector<128x128xf32>, vector<8x128xf32> -> vector<8x128xf32>
    %49 = vector.extract_strided_slice %10 {offsets = [5, 0, 0], sizes = [1, 8, 128], strides = [1, 1, 1]} : vector<8x8x128xf32> to vector<1x8x128xf32>
    %50 = vector.shape_cast %49 : vector<1x8x128xf32> to vector<8x128xf32>
    %51 = arith.addf %48, %50 : vector<8x128xf32>
    %c5 = arith.constant 5 : index
    %c0_28 = arith.constant 0 : index
    %c0_29 = arith.constant 0 : index
    %52 = vector.load %arg6[%c5, %c0_28, %c0_29] : memref<8x8x128xf32, #tpu.memory_space<vmem>>, vector<1x8x128xf32>
    %53 = vector.shape_cast %52 : vector<1x8x128xf32> to vector<8x128xf32>
    %54 = vector.shape_cast %51 : vector<8x128xf32> to vector<1x8x128xf32>
    tpu.vector_store %arg6[%c5, %c0_28, %c0_29], %54 {strides = array<i32>} : memref<8x8x128xf32, #tpu.memory_space<vmem>>, vector<1x8x128xf32>,
    %cst_30 = arith.constant dense<0.000000e+00> : vector<8x128xf32>
    %55 = tpu.matmul %51, %11, %cst_30 {dimension_numbers = #tpu.dot_dimension_numbers<[1], [0], [0], [1], [0, 0, 1, 1], [], []>} : vector<8x128xf32>, vector<128x128xf32>, vector<8x128xf32> -> vector<8x128xf32>
    %56 = vector.extract_strided_slice %10 {offsets = [6, 0, 0], sizes = [1, 8, 128], strides = [1, 1, 1]} : vector<8x8x128xf32> to vector<1x8x128xf32>
    %57 = vector.shape_cast %56 : vector<1x8x128xf32> to vector<8x128xf32>
    %58 = arith.addf %55, %57 : vector<8x128xf32>
    %c6 = arith.constant 6 : index
    %c0_31 = arith.constant 0 : index
    %c0_32 = arith.constant 0 : index
    %59 = vector.load %arg6[%c6, %c0_31, %c0_32] : memref<8x8x128xf32, #tpu.memory_space<vmem>>, vector<1x8x128xf32>
    %60 = vector.shape_cast %59 : vector<1x8x128xf32> to vector<8x128xf32>
    %61 = vector.shape_cast %58 : vector<8x128xf32> to vector<1x8x128xf32>
    tpu.vector_store %arg6[%c6, %c0_31, %c0_32], %61 {strides = array<i32>} : memref<8x8x128xf32, #tpu.memory_space<vmem>>, vector<1x8x128xf32>,
    %cst_33 = arith.constant dense<0.000000e+00> : vector<8x128xf32>
    %62 = tpu.matmul %58, %11, %cst_33 {dimension_numbers = #tpu.dot_dimension_numbers<[1], [0], [0], [1], [0, 0, 1, 1], [], []>} : vector<8x128xf32>, vector<128x128xf32>, vector<8x128xf32> -> vector<8x128xf32>
    %63 = vector.extract_strided_slice %10 {offsets = [7, 0, 0], sizes = [1, 8, 128], strides = [1, 1, 1]} : vector<8x8x128xf32> to vector<1x8x128xf32>
    %64 = vector.shape_cast %63 : vector<1x8x128xf32> to vector<8x128xf32>
    %65 = arith.addf %62, %64 : vector<8x128xf32>
    %c7 = arith.constant 7 : index
    %c0_34 = arith.constant 0 : index
    %c0_35 = arith.constant 0 : index
    %66 = vector.load %arg6[%c7, %c0_34, %c0_35] : memref<8x8x128xf32, #tpu.memory_space<vmem>>, vector<1x8x128xf32>
    %67 = vector.shape_cast %66 : vector<1x8x128xf32> to vector<8x128xf32>
    %68 = vector.shape_cast %65 : vector<8x128xf32> to vector<1x8x128xf32>
    tpu.vector_store %arg6[%c7, %c0_34, %c0_35], %68 {strides = array<i32>} : memref<8x8x128xf32, #tpu.memory_space<vmem>>, vector<1x8x128xf32>,
    %c0_36 = arith.constant 0 : index
    %c0_37 = arith.constant 0 : index
    %69 = vector.load %arg8[%c0_36, %c0_37] : memref<8x128xf32, #tpu.memory_space<vmem>>, vector<8x128xf32>
    tpu.vector_store %arg8[%c0_36, %c0_37], %65 {strides = array<i32>} : memref<8x128xf32, #tpu.memory_space<vmem>>, vector<8x128xf32>,
    %c0_i32_38 = arith.constant 0 : i32
    %70 = arith.cmpi eq, %arg1, %c0_i32_38 : i32
    %71 = arith.extui %70 : i1 to i32
    %c0_i32_39 = arith.constant 0 : i32
    %72 = arith.cmpi ne, %71, %c0_i32_39 : i32
    scf.if %72 {
      %c0_40 = arith.constant 0 : index
      %c0_41 = arith.constant 0 : index
      %73 = vector.load %arg7[%c0_40, %c0_41] : memref<8x128xf32, #tpu.memory_space<vmem>>, vector<8x128xf32>
      tpu.vector_store %arg7[%c0_40, %c0_41], %65 {strides = array<i32>} : memref<8x128xf32, #tpu.memory_space<vmem>>, vector<8x128xf32>,
    } else {
    }
    return
  }
  func.func @transform_0(%arg0: i32, %arg1: i32) -> (i32, i32, i32) {
    %c0_i32 = arith.constant 0 : i32
    %c0_i32_0 = arith.constant 0 : i32
    return %arg1, %arg0, %c0_i32 : i32, i32, i32
  }
  func.func @transform_1(%arg0: i32, %arg1: i32) -> (i32, i32) {
    %c0_i32 = arith.constant 0 : i32
    %c0_i32_0 = arith.constant 0 : i32
    %c0_i32_1 = arith.constant 0 : i32
    return %c0_i32, %c0_i32_0 : i32, i32
  }
  func.func @transform_2(%arg0: i32, %arg1: i32) -> (i32, i32) {
    %c0_i32 = arith.constant 0 : i32
    %c0_i32_0 = arith.constant 0 : i32
    %c0_i32_1 = arith.constant 0 : i32
    return %c0_i32, %c0_i32_0 : i32, i32
  }
  func.func @transform_3(%arg0: i32, %arg1: i32) -> (i32, i32) {
    %c0_i32 = arith.constant 0 : i32
    %c0_i32_0 = arith.constant 0 : i32
    %c0_i32_1 = arith.constant 0 : i32
    return %c0_i32, %c0_i32_0 : i32, i32
  }
  func.func @transform_4(%arg0: i32, %arg1: i32) -> (i32, i32, i32) {
    %c0_i32 = arith.constant 0 : i32
    %c0_i32_0 = arith.constant 0 : i32
    return %arg1, %arg0, %c0_i32 : i32, i32, i32
  }
  func.func @transform_5(%arg0: i32, %arg1: i32) -> (i32, i32) {
    %c0_i32 = arith.constant 0 : i32
    %c0_i32_0 = arith.constant 0 : i32
    return %arg0, %c0_i32 : i32, i32
  }
}

</mosaic_0001>

<bundles_post_ra>
// kernel: reservoir_block_forward.3
= control target key start
LH: loop header
LB: loop body
LE: loop exit
PB: predicated region body
PF: predicated region fallthrough
CT: control target
= control target key end

     0   :  { %vm45_vm0 = vcmask 1043456   ;;  %vm41_vm1 = vcmask 31744   ;;  %v75_v9 = vlaneseq  ;;  %s383_s2 = inlined_call_operand.vmem [shape: f32[4,128], index: 2, kind: input, shape index: {}]   ;;  %s384_s1 = inlined_call_operand.vmem [shape: f32[8,4], index: 1, kind: input, shape index: {}]   ;;  %s385_s3 = inlined_call_operand.vmem [shape: f32[1,128], index: 3, kind: input, shape index: {}]   ;;  %s386_s0 = inlined_call_operand.vmem [shape: f32[8,128], index: 0, kind: input, shape index: {}]   ;;  %s387_s6 = inlined_call_operand.vmem [shape: f32[128,128], index: 6, kind: input, shape index: {}]   ;;  %s388_s4 = inlined_call_operand.vmem [shape: f32[1,128], index: 4, kind: input, shape index: {}]   ;;  %s389_s5 = inlined_call_operand.vmem [shape: f32[1,128], index: 5, kind: input, shape index: {}]   ;;  %s390_s7 = inlined_call_operand.vmem [shape: f32[1,128], index: 7, kind: input, shape index: {}]   ;;  %s391_s8 = inlined_call_operand.vmem [shape: f32[128,128], index: 8, kind: input, shape index: {}]   ;;  %s392_s9 = inlined_call_operand.vmem [shape: f32[1,128], index: 9, kind: input, shape index: {}]   ;;  %s393_s10 = inlined_call_operand.vmem [shape: f32[8,128], index: 10, kind: output, shape index: {}]  }
   0x1   :  { %v36_v0 = vld [vmem:[%s383_s2] sm:$0xf]  ;;  %v120_v7 = vld [vmem:[%s387_s6 + $0x78] sm:$0xff]  ;;  %v119_v8 = vld [vmem:[%s387_s6 + $0x70] sm:$0xff] }
   0x2   :  { %v35_v1 = vld [vmem:[%s384_s1] sm:$0xff]  ;;  %191 = vmatpush.msk.msra.mxu0 %vm45_vm0, %v36_v0  ;;  %125 = vmatpush.msra.mxu1 %v120_v7  ;;  %v76_v10 = vand.u32 127, %v75_v9  ;;  %v118_v16 = vld [vmem:[%s387_s6 + $0x68] sm:$0xff]  ;;  %v116_v18 = vld [vmem:[%s387_s6 + $0x58] sm:$0xff] }
   0x3   :  { %192 = vmatmul.msk.f32.vlgmr.msra.gmra.mxu0 %vm41_vm1, %v35_v1  ;;  %v193_v2 = vld [vmem:[%s385_s3] ss:$0 sm:$0xff]  ;;  %v115_v19 = vld [vmem:[%s387_s6 + $0x50] sm:$0xff]  ;;  %v114_v20 = vld [vmem:[%s387_s6 + $0x48] sm:$0xff] }
   0x4   :  { %v69_v4 = vld [vmem:[%s386_s0] sm:$0xff]  ;;  %126 = vmatpush.msra.mxu1 %v119_v8  ;;  %vm77_vm2 = vcmp.lt.s32.totalorder %v76_v10, 32  ;;  %v112_v22 = vld [vmem:[%s387_s6 + $0x38] sm:$0xff]  ;;  %v111_v23 = vld [vmem:[%s387_s6 + $0x30] sm:$0xff] }
   0x5   :  { %v117_v17 = vld [vmem:[%s387_s6 + $0x60] sm:$0xff]  ;;  %v110_v24 = vld [vmem:[%s387_s6 + $0x28] sm:$0xff]  ;;  %v108_v26 = vld [vmem:[%s387_s6 + $0x18] sm:$0xff] }
   0x6   :  { %127 = vmatpush.msra.mxu1 %v118_v16  ;;  %v113_v21 = vld [vmem:[%s387_s6 + $0x40] sm:$0xff]  ;;  %v107_v27 = vld [vmem:[%s387_s6 + $0x10] sm:$0xff]  ;;  %v106_v28 = vld [vmem:[%s387_s6 + $0x8] sm:$0xff] }
   0x7   :  { %v109_v25 = vld [vmem:[%s387_s6 + $0x20] sm:$0xff]  ;;  %v161_v30 = vld [vmem:[%s391_s8 + $0x78] sm:$0xff]  ;;  %v160_v31 = vld [vmem:[%s391_s8 + $0x70] sm:$0xff] }
   0x8   :  { %128 = vmatpush.msra.mxu1 %v117_v17  ;;  %v105_v29 = vld [vmem:[%s387_s6] sm:$0xff]  ;;  %166 = vmatpush.msra.mxu2 %v161_v30  ;;  %v159_v32 = vld [vmem:[%s391_s8 + $0x68] sm:$0xff]  ;;  %v157_v37 = vld [vmem:[%s391_s8 + $0x58] sm:$0xff] }
   0x9   :  { %v158_v35 = vld [vmem:[%s391_s8 + $0x60] sm:$0xff]  ;;  %v156_v38 = vld [vmem:[%s391_s8 + $0x50] sm:$0xff]  ;;  %v155_v39 = vld [vmem:[%s391_s8 + $0x48] sm:$0xff] }
   0xa   :  { %129 = vmatpush.msra.mxu1 %v116_v18  ;;  %167 = vmatpush.msra.mxu2 %v160_v31  ;;  %v154_v40 = vld [vmem:[%s391_s8 + $0x40] sm:$0xff]  ;;  %v153_v42 = vld [vmem:[%s391_s8 + $0x38] sm:$0xff]  ;;  %v152_v44 = vld [vmem:[%s391_s8 + $0x30] sm:$0xff] }
   0xb   :  { %v151_v46 = vld [vmem:[%s391_s8 + $0x28] sm:$0xff]  ;;  %v150_v48 = vld [vmem:[%s391_s8 + $0x20] sm:$0xff]  ;;  %v149_v50 = vld [vmem:[%s391_s8 + $0x18] sm:$0xff] }
   0xc   :  { %130 = vmatpush.msra.mxu1 %v115_v19  ;;  %168 = vmatpush.msra.mxu2 %v159_v32  ;;  %v194_v52 = vld [vmem:[%s388_s4] ss:$0 sm:$0xff]  ;;  %v148_v58 = vld [vmem:[%s391_s8 + $0x10] sm:$0xff]  ;;  %v147_v59 = vld [vmem:[%s391_s8 + $0x8] sm:$0xff] }
   0xd   :  { %v195_v55 = vld [vmem:[%s389_s5] ss:$0 sm:$0xff] }
   0xe   :  { %131 = vmatpush.msra.mxu1 %v114_v20  ;;  %169 = vmatpush.msra.mxu2 %v158_v35  ;;  %v146_v60 = vld [vmem:[%s391_s8] sm:$0xff] }
   0xf   :  { %v196_v61 = vld [vmem:[%s390_s7] ss:$0 sm:$0xff] }
  0x10   :  { %132 = vmatpush.msra.mxu1 %v113_v21  ;;  %170 = vmatpush.msra.mxu2 %v157_v37  ;;  %v197_v1 = vld [vmem:[%s392_s9] ss:$0 sm:$0xff] }
  0x12   :  { %133 = vmatpush.msra.mxu1 %v112_v22  ;;  %171 = vmatpush.msra.mxu2 %v156_v38 }
  0x14   :  { %134 = vmatpush.msra.mxu1 %v111_v23  ;;  %172 = vmatpush.msra.mxu2 %v155_v39 }
  0x16   :  { %135 = vmatpush.msra.mxu1 %v110_v24  ;;  %173 = vmatpush.msra.mxu2 %v154_v40 }
  0x18   :  { %136 = vmatpush.msra.mxu1 %v109_v25  ;;  %174 = vmatpush.msra.mxu2 %v153_v42 }
  0x1a   :  { %137 = vmatpush.msra.mxu1 %v108_v26  ;;  %175 = vmatpush.msra.mxu2 %v152_v44 }
  0x1c   :  { %138 = vmatpush.msra.mxu1 %v107_v27  ;;  %176 = vmatpush.msra.mxu2 %v151_v46 }
  0x1e   :  { %139 = vmatpush.msra.mxu1 %v106_v28  ;;  %177 = vmatpush.msra.mxu2 %v150_v48 }
  0x20   :  { %140 = vmatpush.msra.mxu1 %v105_v29  ;;  %178 = vmatpush.msra.mxu2 %v149_v50 }
  0x22   :  { %179 = vmatpush.msra.mxu2 %v148_v58 }
  0x24   :  { %180 = vmatpush.msra.mxu2 %v147_v59 }
  0x26   :  { %181 = vmatpush.msra.mxu2 %v146_v60 }
  0x80   :  { %v66_v3 = vpop.f32.mrf.mxu0 }
  0x81   :  { %v67_v5 = vadd.f32 %v193_v2, %v66_v3 }
  0x83   :  { %v70_v6 = vadd.f32 %v69_v4, %v67_v5 }
  0x85   :  { %71 = vadd.xlane.f32.xlu0 %v70_v6 }
  0xf8   :  { %v72_v11 = vpop.xlane.xlu0 %71 }
  0xf9   :  { %v73_v12 = vmul.f32 0.03125, %v72_v11 }
  0xfb   :  { %v74_v13 = vsub.f32 %v70_v6, %v73_v12 }
  0xfd   :  { %v273_v14 = vsel %vm77_vm2, %v74_v13, 0.0 }
  0xfe   :  { %v79_v15 = vmul.f32 %v273_v14, %v273_v14 }
 0x100   :  { %80 = vadd.xlane.f32.xlu0 %v79_v15 }
 0x173   :  { %v81_v33 = vpop.xlane.xlu0 %80 }
 0x174   :  { %v82_v34 = vmul.f32 0.03125, %v81_v33 }
 0x176   :  { %v83_v36 = vadd.f32 1e-05, %v82_v34 }
 0x178   :  { %198 = vrsqrt.f32 %v83_v36  ;;  %vm90_vm4 = vweird.f32 %v83_v36 }
 0x17e   :  { %v199_v41 = vpop.eup %198 }
 0x17f   :  { %v85_v43 = vmul.f32 %v199_v41, %v83_v36  ;;  %vm91_vm3 = vweird.f32 %v199_v41 }
 0x180   :  { %vm92_vm5 = vmor %vm90_vm4, %vm91_vm3 }
 0x181   :  { %v86_v45 = vmul.f32 %v199_v41, %v85_v43 }
 0x183   :  { %v87_v47 = vmul.f32 0.5, %v86_v45 }
 0x185   :  { %v88_v49 = vsub.f32 1.5, %v87_v47 }
 0x187   :  { %v89_v51 = vmul.f32 %v199_v41, %v88_v49 }
 0x189   :  { %v93_v53 = vsel %vm92_vm5, %v199_v41, %v89_v51 }
 0x18a   :  { %v94_v54 = vmul.f32 %v93_v53, %v273_v14 }
 0x18c   :  { %v99_v56 = vmul.f32 %v194_v52, %v94_v54 }
 0x18e   :  { %v104_v57 = vadd.f32 %v195_v55, %v99_v56 }
 0x190   :  { %141 = vmatmul.f32.vlgmr.msra.gmra.mxu1 %v104_v57 }
 0x20d   :  { %v142_v62 = vpop.f32.mrf.mxu1 }
 0x20e   :  { %v143_v63 = vadd.f32 %v196_v61, %v142_v62 }
 0x210   :  { %v145_v0 = vmax.f32 %v143_v63, 0.0 }
 0x212   :  { %182 = vmatmul.f32.vlgmr.msra.gmra.mxu2 %v145_v0 }
 0x295   :  { %v183_v2 = vpop.f32.mrf.mxu2 }
 0x296   :  { %v184_v3 = vadd.f32 %v197_v1, %v183_v2 }
 0x298   :  { %186 = vst [vmem:[%s393_s10] sm:$0xff] %v184_v3 }

// kernel: reservoir_block_forward.2
= control target key start
LH: loop header
LB: loop body
LE: loop exit
PB: predicated region body
PF: predicated region fallthrough
CT: control target
= control target key end

     0   :  { %vm62_vm0 = vcmask 1043456   ;;  %vm37_vm1 = vcmask 31744   ;;  %v330_v18 = vmov 0.0   ;;  %s634_s3 = inlined_call_operand.vmem [shape: f32[128,128], index: 3, kind: input, shape index: {}]   ;;  %s635_s1 = inlined_call_operand.vmem [shape: f32[4,128], index: 1, kind: input, shape index: {}]   ;;  %s636_s0 = inlined_call_operand.vmem [shape: f32[8,8,4], index: 0, kind: input, shape index: {}]   ;;  %s637_s2 = inlined_call_operand.vmem [shape: f32[1,128], index: 2, kind: input, shape index: {}]   ;;  %s638_s4 = inlined_call_operand.vmem [shape: f32[8,8,128], index: 4, kind: output, shape index: {0}]   ;;  %s639_s5 = inlined_call_operand.vmem [shape: f32[8,128], index: 5, kind: output, shape index: {1}]  }
   0x1   :  { %v364_v0 = vld [vmem:[%s634_s3 + $0x78] sm:$0xff]  ;;  %v369_v1 = vld [vmem:[%s634_s3 + $0x70] sm:$0xff]  ;;  %v376_v2 = vld [vmem:[%s634_s3 + $0x68] sm:$0xff] }
   0x2   :  { %124 = vmatpush.msra.mxu1 %v364_v0  ;;  %145 = vmatpush.msra.mxu2 %v364_v0  ;;  %v384_v3 = vld [vmem:[%s634_s3 + $0x60] sm:$0xff]  ;;  %v397_v6 = vld [vmem:[%s634_s3 + $0x58] sm:$0xff]  ;;  %v406_v7 = vld [vmem:[%s634_s3 + $0x50] sm:$0xff] }
   0x3   :  { %167 = vmatpush.msra.mxu3 %v364_v0  ;;  %v32_v4 = vld [vmem:[%s635_s1] sm:$0xf]  ;;  %v415_v8 = vld [vmem:[%s634_s3 + $0x48] sm:$0xff]  ;;  %v433_v10 = vld [vmem:[%s634_s3 + $0x38] sm:$0xff] }
   0x4   :  { %125 = vmatpush.msra.mxu1 %v369_v1  ;;  %146 = vmatpush.msra.mxu2 %v369_v1  ;;  %v24_v5 = vld [vmem:[%s636_s0] sm:$0xff]  ;;  %v442_v11 = vld [vmem:[%s634_s3 + $0x30] sm:$0xff]  ;;  %v451_v12 = vld [vmem:[%s634_s3 + $0x28] sm:$0xff] }
   0x5   :  { %168 = vmatpush.msra.mxu3 %v369_v1  ;;  %312 = vmatpush.msk.msra.mxu0 %vm62_vm0, %v32_v4  ;;  %v424_v9 = vld [vmem:[%s634_s3 + $0x40] sm:$0xff]  ;;  %v469_v14 = vld [vmem:[%s634_s3 + $0x18] sm:$0xff]  ;;  %v478_v15 = vld [vmem:[%s634_s3 + $0x10] sm:$0xff] }
   0x6   :  { %126 = vmatpush.msra.mxu1 %v376_v2  ;;  %313 = vmatmul.msk.f32.vlgmr.msra.gmra.mxu0 %vm37_vm1, %v24_v5  ;;  %v460_v13 = vld [vmem:[%s634_s3 + $0x20] sm:$0xff]  ;;  %v487_v16 = vld [vmem:[%s634_s3 + $0x8] sm:$0xff]  ;;  %v26_v25 = vld [vmem:[%s636_s0 + $0x10] sm:$0xff] }
   0x7   :  { %147 = vmatpush.msra.mxu2 %v376_v2  ;;  %169 = vmatpush.msra.mxu3 %v376_v2  ;;  %v496_v17 = vld [vmem:[%s634_s3] sm:$0xff]  ;;  %v25_v19 = vld [vmem:[%s636_s0 + $0x8] sm:$0xff]  ;;  %v27_v30 = vld [vmem:[%s636_s0 + $0x18] sm:$0xff] }
   0x8   :  { %127 = vmatpush.msra.mxu1 %v384_v3  ;;  %255 = vmatpush.msrb.mxu0 %v364_v0  ;;  %v329_v20 = vld [vmem:[%s637_s2] ss:$0 sm:$0xff]  ;;  %v29_v40 = vld [vmem:[%s636_s0 + $0x28] sm:$0xff]  ;;  %v30_v41 = vld [vmem:[%s636_s0 + $0x30] sm:$0xff] }
   0x9   :  { %148 = vmatpush.msra.mxu2 %v384_v3  ;;  %170 = vmatpush.msra.mxu3 %v384_v3  ;;  %v28_v35 = vld [vmem:[%s636_s0 + $0x20] sm:$0xff]  ;;  %v31_v42 = vld [vmem:[%s636_s0 + $0x38] sm:$0xff] }
   0xa   :  { %128 = vmatpush.msra.mxu1 %v397_v6  ;;  %256 = vmatpush.msrb.mxu0 %v369_v1 }
   0xb   :  { %149 = vmatpush.msra.mxu2 %v397_v6  ;;  %171 = vmatpush.msra.mxu3 %v397_v6 }
   0xc   :  { %129 = vmatpush.msra.mxu1 %v406_v7  ;;  %257 = vmatpush.msrb.mxu0 %v376_v2 }
   0xd   :  { %150 = vmatpush.msra.mxu2 %v406_v7  ;;  %172 = vmatpush.msra.mxu3 %v406_v7 }
   0xe   :  { %130 = vmatpush.msra.mxu1 %v415_v8  ;;  %258 = vmatpush.msrb.mxu0 %v384_v3 }
   0xf   :  { %151 = vmatpush.msra.mxu2 %v415_v8  ;;  %173 = vmatpush.msra.mxu3 %v415_v8 }
  0x10   :  { %131 = vmatpush.msra.mxu1 %v424_v9  ;;  %259 = vmatpush.msrb.mxu0 %v397_v6 }
  0x11   :  { %152 = vmatpush.msra.mxu2 %v424_v9  ;;  %174 = vmatpush.msra.mxu3 %v424_v9 }
  0x12   :  { %132 = vmatpush.msra.mxu1 %v433_v10  ;;  %260 = vmatpush.msrb.mxu0 %v406_v7 }
  0x13   :  { %153 = vmatpush.msra.mxu2 %v433_v10  ;;  %175 = vmatpush.msra.mxu3 %v433_v10 }
  0x14   :  { %133 = vmatpush.msra.mxu1 %v442_v11  ;;  %261 = vmatpush.msrb.mxu0 %v415_v8 }
  0x15   :  { %154 = vmatpush.msra.mxu2 %v442_v11  ;;  %176 = vmatpush.msra.mxu3 %v442_v11 }
  0x16   :  { %134 = vmatpush.msra.mxu1 %v451_v12  ;;  %262 = vmatpush.msrb.mxu0 %v424_v9 }
  0x17   :  { %155 = vmatpush.msra.mxu2 %v451_v12  ;;  %177 = vmatpush.msra.mxu3 %v451_v12 }
  0x18   :  { %135 = vmatpush.msra.mxu1 %v460_v13  ;;  %263 = vmatpush.msrb.mxu0 %v433_v10 }
  0x19   :  { %156 = vmatpush.msra.mxu2 %v460_v13  ;;  %178 = vmatpush.msra.mxu3 %v460_v13 }
  0x1a   :  { %136 = vmatpush.msra.mxu1 %v469_v14  ;;  %264 = vmatpush.msrb.mxu0 %v442_v11 }
  0x1b   :  { %157 = vmatpush.msra.mxu2 %v469_v14  ;;  %179 = vmatpush.msra.mxu3 %v469_v14 }
  0x1c   :  { %137 = vmatpush.msra.mxu1 %v478_v15  ;;  %265 = vmatpush.msrb.mxu0 %v451_v12 }
  0x1d   :  { %158 = vmatpush.msra.mxu2 %v478_v15  ;;  %180 = vmatpush.msra.mxu3 %v478_v15 }
  0x1e   :  { %138 = vmatpush.msra.mxu1 %v487_v16  ;;  %266 = vmatpush.msrb.mxu0 %v460_v13 }
  0x1f   :  { %159 = vmatpush.msra.mxu2 %v487_v16  ;;  %181 = vmatpush.msra.mxu3 %v487_v16 }
  0x20   :  { %139 = vmatpush.msra.mxu1 %v496_v17  ;;  %267 = vmatpush.msrb.mxu0 %v469_v14 }
  0x21   :  { %140 = vmatmul.f32.vlgmr.msra.gmra.mxu1 %v330_v18  ;;  %160 = vmatpush.msra.mxu2 %v496_v17 }
  0x22   :  { %182 = vmatpush.msra.mxu3 %v496_v17  ;;  %189 = vmatpush.msrb.mxu1 %v364_v0 }
  0x23   :  { %211 = vmatpush.msrb.mxu2 %v364_v0  ;;  %268 = vmatpush.msrb.mxu0 %v478_v15 }
  0x24   :  { %233 = vmatpush.msrb.mxu3 %v364_v0  ;;  %190 = vmatpush.msrb.mxu1 %v369_v1 }
  0x25   :  { %212 = vmatpush.msrb.mxu2 %v369_v1  ;;  %269 = vmatpush.msrb.mxu0 %v487_v16 }
  0x26   :  { %234 = vmatpush.msrb.mxu3 %v369_v1  ;;  %191 = vmatpush.msrb.mxu1 %v376_v2 }
  0x27   :  { %213 = vmatpush.msrb.mxu2 %v376_v2  ;;  %270 = vmatpush.msrb.mxu0 %v496_v17 }
  0x28   :  { %235 = vmatpush.msrb.mxu3 %v376_v2  ;;  %192 = vmatpush.msrb.mxu1 %v384_v3 }
  0x29   :  { %214 = vmatpush.msrb.mxu2 %v384_v3  ;;  %314 = vmatmul.msk.f32.gmra.mxu0 %vm37_vm1, %v25_v19 }
  0x2a   :  { %236 = vmatpush.msrb.mxu3 %v384_v3  ;;  %193 = vmatpush.msrb.mxu1 %v397_v6 }
  0x2b   :  { %215 = vmatpush.msrb.mxu2 %v397_v6 }
  0x2c   :  { %237 = vmatpush.msrb.mxu3 %v397_v6  ;;  %194 = vmatpush.msrb.mxu1 %v406_v7 }
  0x2d   :  { %216 = vmatpush.msrb.mxu2 %v406_v7 }
  0x2e   :  { %238 = vmatpush.msrb.mxu3 %v406_v7  ;;  %195 = vmatpush.msrb.mxu1 %v415_v8 }
  0x2f   :  { %217 = vmatpush.msrb.mxu2 %v415_v8 }
  0x30   :  { %239 = vmatpush.msrb.mxu3 %v415_v8  ;;  %196 = vmatpush.msrb.mxu1 %v424_v9 }
  0x31   :  { %218 = vmatpush.msrb.mxu2 %v424_v9  ;;  %315 = vmatmul.msk.f32.gmra.mxu0 %vm37_vm1, %v26_v25 }
  0x32   :  { %240 = vmatpush.msrb.mxu3 %v424_v9  ;;  %197 = vmatpush.msrb.mxu1 %v433_v10 }
  0x33   :  { %219 = vmatpush.msrb.mxu2 %v433_v10 }
  0x34   :  { %241 = vmatpush.msrb.mxu3 %v433_v10  ;;  %198 = vmatpush.msrb.mxu1 %v442_v11 }
  0x35   :  { %220 = vmatpush.msrb.mxu2 %v442_v11 }
  0x36   :  { %242 = vmatpush.msrb.mxu3 %v442_v11  ;;  %199 = vmatpush.msrb.mxu1 %v451_v12 }
  0x37   :  { %221 = vmatpush.msrb.mxu2 %v451_v12 }
  0x38   :  { %243 = vmatpush.msrb.mxu3 %v451_v12  ;;  %200 = vmatpush.msrb.mxu1 %v460_v13 }
  0x39   :  { %222 = vmatpush.msrb.mxu2 %v460_v13  ;;  %316 = vmatmul.msk.f32.gmra.mxu0 %vm37_vm1, %v27_v30 }
  0x3a   :  { %244 = vmatpush.msrb.mxu3 %v460_v13  ;;  %201 = vmatpush.msrb.mxu1 %v469_v14 }
  0x3b   :  { %223 = vmatpush.msrb.mxu2 %v469_v14 }
  0x3c   :  { %245 = vmatpush.msrb.mxu3 %v469_v14  ;;  %202 = vmatpush.msrb.mxu1 %v478_v15 }
  0x3d   :  { %224 = vmatpush.msrb.mxu2 %v478_v15 }
  0x3e   :  { %246 = vmatpush.msrb.mxu3 %v478_v15  ;;  %203 = vmatpush.msrb.mxu1 %v487_v16 }
  0x3f   :  { %225 = vmatpush.msrb.mxu2 %v487_v16 }
  0x40   :  { %247 = vmatpush.msrb.mxu3 %v487_v16  ;;  %204 = vmatpush.msrb.mxu1 %v496_v17 }
  0x41   :  { %226 = vmatpush.msrb.mxu2 %v496_v17  ;;  %317 = vmatmul.msk.f32.gmra.mxu0 %vm37_vm1, %v28_v35 }
  0x42   :  { %248 = vmatpush.msrb.mxu3 %v496_v17  ;;  %277 = vmatpush.msra.mxu1 %v364_v0 }
  0x44   :  { %278 = vmatpush.msra.mxu1 %v369_v1 }
  0x46   :  { %279 = vmatpush.msra.mxu1 %v376_v2 }
  0x48   :  { %280 = vmatpush.msra.mxu1 %v384_v3 }
  0x49   :  { %318 = vmatmul.msk.f32.gmra.mxu0 %vm37_vm1, %v29_v40 }
  0x4a   :  { %281 = vmatpush.msra.mxu1 %v397_v6 }
  0x4c   :  { %282 = vmatpush.msra.mxu1 %v406_v7 }
  0x4e   :  { %283 = vmatpush.msra.mxu1 %v415_v8 }
  0x50   :  { %284 = vmatpush.msra.mxu1 %v424_v9 }
  0x51   :  { %319 = vmatmul.msk.f32.gmra.mxu0 %vm37_vm1, %v30_v41 }
  0x52   :  { %285 = vmatpush.msra.mxu1 %v433_v10 }
  0x54   :  { %286 = vmatpush.msra.mxu1 %v442_v11 }
  0x56   :  { %287 = vmatpush.msra.mxu1 %v451_v12 }
  0x58   :  { %288 = vmatpush.msra.mxu1 %v460_v13 }
  0x59   :  { %320 = vmatmul.msk.f32.gmra.mxu0 %vm37_vm1, %v31_v42 }
  0x5a   :  { %289 = vmatpush.msra.mxu1 %v469_v14 }
  0x5c   :  { %290 = vmatpush.msra.mxu1 %v478_v15 }
  0x5e   :  { %291 = vmatpush.msra.mxu1 %v487_v16 }
  0x60   :  { %292 = vmatpush.msra.mxu1 %v496_v17 }
  0x83   :  { %v83_v21 = vpop.f32.mrf.mxu0 }
  0x84   :  { %v84_v22 = vadd.f32 %v329_v20, %v83_v21 }
  0x9e   :  { %v141_v23 = vpop.f32.mrf.mxu1 }
  0x9f   :  { %v142_v24 = vadd.f32 %v141_v23, %v84_v22 }
  0xa1   :  { %144 = vst [vmem:[%s638_s4] sm:$0xff] %v142_v24  ;;  %161 = vmatmul.f32.vlgmr.msra.gmra.mxu2 %v142_v24 }
  0xa6   :  { %v86_v26 = vpop.f32.mrf.mxu0 }
  0xa7   :  { %v87_v27 = vadd.f32 %v329_v20, %v86_v26 }
  0xae   :  { %v89_v31 = vpop.f32.mrf.mxu0 }
  0xaf   :  { %v90_v32 = vadd.f32 %v329_v20, %v89_v31 }
  0xb6   :  { %v92_v36 = vpop.f32.mrf.mxu0 }
  0xb7   :  { %v93_v37 = vadd.f32 %v329_v20, %v92_v36 }
  0xbe   :  { %v95_v43 = vpop.f32.mrf.mxu0 }
  0xbf   :  { %v96_v44 = vadd.f32 %v329_v20, %v95_v43 }
  0xc6   :  { %v98_v47 = vpop.f32.mrf.mxu0 }
  0xc7   :  { %v99_v48 = vadd.f32 %v329_v20, %v98_v47 }
  0xce   :  { %v101_v51 = vpop.f32.mrf.mxu0 }
  0xcf   :  { %v102_v53 = vadd.f32 %v329_v20, %v101_v51 }
  0xd6   :  { %v104_v52 = vpop.f32.mrf.mxu0 }
  0xd7   :  { %v105_v56 = vadd.f32 %v329_v20, %v104_v52 }
 0x124   :  { %v162_v28 = vpop.f32.mrf.mxu2 }
 0x125   :  { %v163_v29 = vadd.f32 %v162_v28, %v87_v27 }
 0x127   :  { %321 = vst [vmem:[%s638_s4 + $0x8] sm:$0xff] %v163_v29  ;;  %183 = vmatmul.f32.vlgmr.msra.gmra.mxu3 %v163_v29 }
 0x1aa   :  { %v184_v33 = vpop.f32.mrf.mxu3 }
 0x1ab   :  { %v185_v34 = vadd.f32 %v184_v33, %v90_v32 }
 0x1ad   :  { %322 = vst [vmem:[%s638_s4 + $0x10] sm:$0xff] %v185_v34  ;;  %205 = vmatmul.f32.vlgmr.msrb.gmra.mxu1 %v185_v34 }
 0x22a   :  { %v206_v38 = vpop.f32.mrf.mxu1 }
 0x22b   :  { %v207_v39 = vadd.f32 %v206_v38, %v93_v37 }
 0x22d   :  { %323 = vst [vmem:[%s638_s4 + $0x18] sm:$0xff] %v207_v39  ;;  %227 = vmatmul.f32.vlgmr.msrb.gmra.mxu2 %v207_v39 }
 0x2b0   :  { %v228_v45 = vpop.f32.mrf.mxu2 }
 0x2b1   :  { %v229_v46 = vadd.f32 %v228_v45, %v96_v44 }
 0x2b3   :  { %324 = vst [vmem:[%s638_s4 + $0x20] sm:$0xff] %v229_v46  ;;  %249 = vmatmul.f32.vlgmr.msrb.gmra.mxu3 %v229_v46 }
 0x336   :  { %v250_v49 = vpop.f32.mrf.mxu3 }
 0x337   :  { %v251_v50 = vadd.f32 %v250_v49, %v99_v48 }
 0x339   :  { %325 = vst [vmem:[%s638_s4 + $0x28] sm:$0xff] %v251_v50  ;;  %271 = vmatmul.f32.vlgmr.msrb.gmra.mxu0 %v251_v50 }
 0x3b6   :  { %v272_v54 = vpop.f32.mrf.mxu0 }
 0x3b7   :  { %v273_v55 = vadd.f32 %v272_v54, %v102_v53 }
 0x3b9   :  { %326 = vst [vmem:[%s638_s4 + $0x30] sm:$0xff] %v273_v55  ;;  %293 = vmatmul.f32.vlgmr.msra.gmra.mxu1 %v273_v55 }
 0x436   :  { %v294_v57 = vpop.f32.mrf.mxu1 }
 0x437   :  { %v295_v58 = vadd.f32 %v294_v57, %v105_v56 }
 0x439   :  { %327 = vst [vmem:[%s638_s4 + $0x38] sm:$0xff] %v295_v58 }
 0x43a   :  { %303 = vst [vmem:[%s639_s5] sm:$0xff] %v295_v58 }

</bundles_post_ra>
